<compile_context>
chip_gen: v5e
topology: v5e:2x2
jax: 0.10.0
libtpu: 0.0.40
codegen_flags: <defaults>
</compile_context>

<pallas_src>
import functools

import jax
import jax.numpy as jnp
from jax.experimental import pallas as pl
from jax.experimental.pallas import tpu as pltpu

BN_EPS = 1e-5


# --------------------------------------------------------------------------- #
# Kernels
# --------------------------------------------------------------------------- #
def _layer1_kernel(x_ref, w1_ref, h1_ref, sum_ref, sq_ref):
    # Layer-1 pre-activation; bias omitted (cancelled by training-mode BN).
    h1 = jnp.dot(x_ref[...], w1_ref[...], preferred_element_type=jnp.float32)
    h1_ref[...] = h1.astype(h1_ref.dtype)
    # Padded batch rows of x are zero and there is no bias, so h1's padded
    # rows are exactly zero -> no masking needed for the statistics.
    sum_ref[...] = jnp.sum(h1, axis=0, keepdims=True).reshape(sum_ref.shape)
    sq_ref[...] = jnp.sum(h1 * h1, axis=0, keepdims=True).reshape(sq_ref.shape)


def _layer2_kernel(n_true, needs_mask,
                   h1_ref, w2_ref, sc1_ref, sh1_ref,
                   h2_ref, sum_ref, sq_ref):
    tile = pl.program_id(0)
    n_tiles = pl.num_programs(0)
    tb = h1_ref.shape[0]

    # BN1 folded into one FMA (f32 math; v5e has no bf16 VPU), then ReLU.
    a1 = jnp.maximum(
        h1_ref[...].astype(jnp.float32) * sc1_ref[...] + sh1_ref[...], 0.0)
    h2 = jnp.dot(a1.astype(jnp.bfloat16), w2_ref[...],
                 preferred_element_type=jnp.float32)
    h2_ref[...] = h2.astype(h2_ref.dtype)

    def write_stats(h):
        sum_ref[...] = jnp.sum(h, axis=0, keepdims=True).reshape(sum_ref.shape)
        sq_ref[...] = jnp.sum(h * h, axis=0, keepdims=True).reshape(sq_ref.shape)

    if needs_mask:
        # Padded batch rows of h2 are nonzero (relu(shift1) @ w2); they only
        # exist in the last tile, so only that tile pays for the select.
        @pl.when(tile == n_tiles - 1)
        def _():
            row = jax.lax.broadcasted_iota(jnp.int32, (tb, 1), 0) + tile * tb
            write_stats(jnp.where(row < n_true, h2, 0.0))

        @pl.when(tile < n_tiles - 1)
        def _():
            write_stats(h2)
    else:
        write_stats(h2)


def _layer3_kernel(h2_ref, w3_ref, sc2_ref, sh2_ref, b3_ref, o_ref):
    a2 = jnp.maximum(
        h2_ref[...].astype(jnp.float32) * sc2_ref[...] + sh2_ref[...], 0.0)
    y = jnp.dot(a2.astype(jnp.bfloat16), w3_ref[...],
                preferred_element_type=jnp.float32) + b3_ref[...]
    # sigmoid(y) == 0.5 * tanh(0.5 * y) + 0.5 : a single EUP transcendental.
    o_ref[...] = (0.5 * jnp.tanh(0.5 * y) + 0.5).astype(o_ref.dtype)


# --------------------------------------------------------------------------- #
# Host-side helpers
# --------------------------------------------------------------------------- #
def _round_up(v, m):
    return (v + m - 1) // m * m


def _pad2(a, r, c, dtype=None):
    out = jnp.zeros((r, c), a.dtype).at[:a.shape[0], :a.shape[1]].set(a)
    return out.astype(dtype) if dtype is not None else out


def _device_vmem_bytes():
    try:
        kind = jax.devices()[0].device_kind.lower()
    except Exception:
        kind = ""
    # v5e / v5p / v6e: 128 MiB VMEM per core; v7x (and unknown): 64 MiB.
    return (128 << 20) if ("v5" in kind or "v6" in kind) else (64 << 20)


def _finalize_bn(sums, sqs, gamma, beta, n_true):
    """Combine per-tile partial sums into BN scale/shift (tiny [1,hp] math)."""
    mu = jnp.sum(sums, axis=0) / n_true              # (1, hp)
    var = jnp.sum(sqs, axis=0) / n_true - mu * mu    # biased (training) var
    var = jnp.maximum(var, 0.0)                      # guard cancellation
    scale = gamma * jax.lax.rsqrt(var + BN_EPS)
    shift = beta - mu * scale
    return scale, shift


def mlp_predictor(x, params, *, batch_tile=None):
    """x: [N, feature_dim] float32. params: dict from init_params."""
    n, f = x.shape
    h = params["w1"].shape[1]

    fp = _round_up(f, 128)                 # lane-dense feature dim
    hp = _round_up(h, 128)                 # lane-dense hidden dim

    phys_vmem = _device_vmem_bytes()
    vmem_cap = phys_vmem * 3 // 4          # leave compiler headroom

    if batch_tile is None:
        batch_tile = 512 if phys_vmem >= (128 << 20) else 256

    tb = min(batch_tile, _round_up(n, 16))  # bf16 sublane packing -> mult of 16

    def resident(t):
        # Worst per-call resident set: double-buffered batch tiles + pinned
        # (double-buffered) weight + small vectors / per-tile stats.
        r1 = 2 * (t * fp * 2 + fp * hp * 2 + t * hp * 2) + 4 * 8 * hp * 4
        r2 = 2 * (2 * t * hp * 2 + hp * hp * 2) + 8 * 8 * hp * 4
        r3 = 2 * (t * hp * 2 + hp * fp * 2 + t * fp * 4) + 8 * 8 * max(hp, fp) * 4
        return max(r1, r2, r3)

    while tb > 16 and resident(tb) > vmem_cap:
        tb = max(16, _round_up(tb // 2, 16))

    n_pad = _round_up(n, tb)
    n_tiles = n_pad // tb
    needs_mask = n_pad != n

    # Zero padding is semantics-preserving: padded feature/hidden lanes stay
    # zero through every layer (gamma/beta/b3 padded with zeros), padded batch
    # rows are excluded from the BN statistics and sliced off at the end.
    xp = _pad2(x, n_pad, fp, jnp.bfloat16)
    w1 = _pad2(params["w1"], fp, hp, jnp.bfloat16)
    w2 = _pad2(params["w2"], hp, hp, jnp.bfloat16)
    w3 = _pad2(params["w3"], hp, fp, jnp.bfloat16)
    g1 = _pad2(params["g1"], 1, hp)
    be1 = _pad2(params["be1"], 1, hp)
    g2 = _pad2(params["g2"], 1, hp)
    be2 = _pad2(params["be2"], 1, hp)
    b3 = _pad2(params["b3"], 1, fp)
    # b1 / b2 intentionally unused: exactly cancelled by training-mode BN.

    tile_map = lambda i: (i, 0)       # batch-tiled 2-D arrays
    pin_map = lambda i: (0, 0)        # weights / vectors resident in VMEM
    stat_map = lambda i: (i, 0, 0)    # per-tile partial statistics

    def vlimit(r):
        return int(min(max(2 * r, 32 << 20), vmem_cap))

    # TODO(synk): single-buffer the constant-index weight BlockSpecs
    # (pipeline_mode=pl.Buffered(1)) once a 1-deep pipeline is supported; each
    # call already pins only one weight matrix, which keeps VMEM pressure low.

    # ---- call 1: h1 = x @ w1, plus per-tile BN1 partial statistics ---------
    r1 = 2 * (tb * fp * 2 + fp * hp * 2 + tb * hp * 2) + 4 * 8 * hp * 4
    h1, s1, q1 = pl.pallas_call(
        _layer1_kernel,
        out_shape=(jax.ShapeDtypeStruct((n_pad, hp), jnp.bfloat16),
                   jax.ShapeDtypeStruct((n_tiles, 1, hp), jnp.float32),
                   jax.ShapeDtypeStruct((n_tiles, 1, hp), jnp.float32)),
        grid_spec=pltpu.PrefetchScalarGridSpec(
            num_scalar_prefetch=0,
            grid=(n_tiles,),
            in_specs=[pl.BlockSpec((tb, fp), tile_map),
                      pl.BlockSpec((fp, hp), pin_map)],
            out_specs=[pl.BlockSpec((tb, hp), tile_map),
                       pl.BlockSpec((1, 1, hp), stat_map),
                       pl.BlockSpec((1, 1, hp), stat_map)]),
        compiler_params=pltpu.CompilerParams(
            dimension_semantics=("parallel",),
            vmem_limit_bytes=vlimit(r1)),
    )(xp, w1)

    scale1, shift1 = _finalize_bn(s1, q1, g1, be1, n)

    # ---- call 2: h2 = relu(bn1(h1)) @ w2, plus BN2 partial statistics ------
    r2 = 2 * (2 * tb * hp * 2 + hp * hp * 2) + 8 * 8 * hp * 4
    h2, s2, q2 = pl.pallas_call(
        functools.partial(_layer2_kernel, n, needs_mask),
        out_shape=(jax.ShapeDtypeStruct((n_pad, hp), jnp.bfloat16),
                   jax.ShapeDtypeStruct((n_tiles, 1, hp), jnp.float32),
                   jax.ShapeDtypeStruct((n_tiles, 1, hp), jnp.float32)),
        grid_spec=pltpu.PrefetchScalarGridSpec(
            num_scalar_prefetch=0,
            grid=(n_tiles,),
            in_specs=[pl.BlockSpec((tb, hp), tile_map),
                      pl.BlockSpec((hp, hp), pin_map),
                      pl.BlockSpec((1, hp), pin_map),
                      pl.BlockSpec((1, hp), pin_map)],
            out_specs=[pl.BlockSpec((tb, hp), tile_map),
                       pl.BlockSpec((1, 1, hp), stat_map),
                       pl.BlockSpec((1, 1, hp), stat_map)]),
        compiler_params=pltpu.CompilerParams(
            dimension_semantics=("parallel",),
            vmem_limit_bytes=vlimit(r2)),
    )(h1, w2, scale1, shift1)

    scale2, shift2 = _finalize_bn(s2, q2, g2, be2, n)

    # ---- call 3: out = sigmoid(relu(bn2(h2)) @ w3 + b3) ---------------------
    r3 = 2 * (tb * hp * 2 + hp * fp * 2 + tb * fp * 4) + 8 * 8 * max(hp, fp) * 4
    out = pl.pallas_call(
        _layer3_kernel,
        out_shape=jax.ShapeDtypeStruct((n_pad, fp), jnp.float32),
        grid_spec=pltpu.PrefetchScalarGridSpec(
            num_scalar_prefetch=0,
            grid=(n_tiles,),
            in_specs=[pl.BlockSpec((tb, hp), tile_map),
                      pl.BlockSpec((hp, fp), pin_map),
                      pl.BlockSpec((1, hp), pin_map),
                      pl.BlockSpec((1, hp), pin_map),
                      pl.BlockSpec((1, fp), pin_map)],
            out_specs=pl.BlockSpec((tb, fp), tile_map)),
        compiler_params=pltpu.CompilerParams(
            dimension_semantics=("parallel",),
            vmem_limit_bytes=vlimit(r3)),
    )(h2, w3, scale2, shift2, b3)

    return out[:n, :f]


# --------------------------------------------------------------------------- #
# Reference / test harness
# --------------------------------------------------------------------------- #
def init_params(key, feature_dim, hidden_dim):
    """Deterministic synthetic parameters matching MLPPredictor(layers=3)."""
    ks = jax.random.split(key, 6)
    scale = 0.05

    def lin(kw, kb, d_in, d_out):
        w = scale * jax.random.normal(kw, (d_in, d_out), jnp.float32)  # [in, out]
        b = scale * jax.random.normal(kb, (1, d_out), jnp.float32)
        return w, b

    w1, b1 = lin(ks[0], ks[1], feature_dim, hidden_dim)
    w2, b2 = lin(ks[2], ks[3], hidden_dim, hidden_dim)
    w3, b3 = lin(ks[4], ks[5], hidden_dim, feature_dim)
    return {
        "w1": w1, "b1": b1,   # b1/b2 only used by the reference; the kernel
        "w2": w2, "b2": b2,   # drops them (cancelled by training-mode BN).
        "w3": w3, "b3": b3,
        "g1": jnp.ones((1, hidden_dim), jnp.float32),
        "be1": jnp.zeros((1, hidden_dim), jnp.float32),
        "g2": jnp.ones((1, hidden_dim), jnp.float32),
        "be2": jnp.zeros((1, hidden_dim), jnp.float32),
    }


def reference(x, p):
    """Pure-JAX f32 reference of the PyTorch forward (training-mode BN)."""
    def bn_relu(h, g, b):
        mu = h.mean(0, keepdims=True)
        var = ((h - mu) ** 2).mean(0, keepdims=True)   # biased variance
        return jnp.maximum((h - mu) / jnp.sqrt(var + BN_EPS) * g + b, 0.0)

    h = bn_relu(x @ p["w1"] + p["b1"], p["g1"], p["be1"])
    h = bn_relu(h @ p["w2"] + p["b2"], p["g2"], p["be2"])
    return jax.nn.sigmoid(h @ p["w3"] + p["b3"])


if __name__ == "__main__":
    key = jax.random.PRNGKey(0)
    k_x, k_p = jax.random.split(key)

    batch, feature_dim, hidden_dim = 8, 32, 64
    x = jax.random.normal(k_x, (batch, feature_dim), jnp.float32)
    params = init_params(k_p, feature_dim, hidden_dim)

    fwd = jax.jit(mlp_predictor)
    out = jax.block_until_ready(fwd(x, params))
    ref = reference(x, params)

    assert out.shape == (batch, feature_dim)
    err = float(jnp.max(jnp.abs(out - ref)))
    # bf16 matmul operands + bf16 activation caches -> loosened tolerance.
    assert err < 2e-2, f"mismatch vs reference: max abs err {err}"
    print("KERNEL_OK")
</pallas_src>

<mosaic_0001>
module attributes {stable_mosaic.version = 11 : i64} {
  func.func @_layer3_kernel(%arg0: i32, %arg1: memref<16x128xbf16, #tpu.memory_space<vmem>>, %arg2: memref<128x128xbf16, #tpu.memory_space<vmem>>, %arg3: memref<1x128xf32, #tpu.memory_space<vmem>>, %arg4: memref<1x128xf32, #tpu.memory_space<vmem>>, %arg5: memref<1x128xf32, #tpu.memory_space<vmem>>, %arg6: memref<16x128xf32, #tpu.memory_space<vmem>>) attributes {dimension_semantics = [#tpu.dimension_semantics<parallel>], iteration_bounds = array<i64: 1>, scalar_prefetch = 0 : i64, scratch_operands = 0 : i64, tpu.core_type = #tpu.core_type<tc>, window_params = [{transform_indices = @transform_0, window_bounds = array<i64: 16, 128>}, {pipeline_mode = #tpu.pipeline_mode<synchronous>, transform_indices = @transform_1, window_bounds = array<i64: 128, 128>}, {pipeline_mode = #tpu.pipeline_mode<synchronous>, transform_indices = @transform_2, window_bounds = array<i64: 1, 128>}, {pipeline_mode = #tpu.pipeline_mode<synchronous>, transform_indices = @transform_3, window_bounds = array<i64: 1, 128>}, {pipeline_mode = #tpu.pipeline_mode<synchronous>, transform_indices = @transform_4, window_bounds = array<i64: 1, 128>}, {transform_indices = @transform_5, window_bounds = array<i64: 16, 128>}]} {
    %c0 = arith.constant 0 : index
    %c0_0 = arith.constant 0 : index
    %0 = vector.load %arg1[%c0, %c0_0] : memref<16x128xbf16, #tpu.memory_space<vmem>>, vector<16x128xbf16>
    %1 = arith.extf %0 : vector<16x128xbf16> to vector<16x128xf32>
    %c0_1 = arith.constant 0 : index
    %c0_2 = arith.constant 0 : index
    %2 = vector.load %arg3[%c0_1, %c0_2] : memref<1x128xf32, #tpu.memory_space<vmem>>, vector<1x128xf32>
    %3 = vector.broadcast %2 : vector<1x128xf32> to vector<16x128xf32>
    %4 = arith.mulf %1, %3 : vector<16x128xf32>
    %c0_3 = arith.constant 0 : index
    %c0_4 = arith.constant 0 : index
    %5 = vector.load %arg4[%c0_3, %c0_4] : memref<1x128xf32, #tpu.memory_space<vmem>>, vector<1x128xf32>
    %6 = vector.broadcast %5 : vector<1x128xf32> to vector<16x128xf32>
    %7 = arith.addf %4, %6 : vector<16x128xf32>
    %cst = arith.constant 0.000000e+00 : f32
    %8 = vector.broadcast %cst : f32 to vector<16x128xf32>
    %9 = arith.maximumf %7, %8 : vector<16x128xf32>
    %10 = arith.truncf %9 : vector<16x128xf32> to vector<16x128xbf16>
    %c0_5 = arith.constant 0 : index
    %c0_6 = arith.constant 0 : index
    %11 = vector.load %arg2[%c0_5, %c0_6] : memref<128x128xbf16, #tpu.memory_space<vmem>>, vector<128x128xbf16>
    %cst_7 = arith.constant dense<0.000000e+00> : vector<16x128xf32>
    %12 = tpu.matmul %10, %11, %cst_7 {dimension_numbers = #tpu.dot_dimension_numbers<[1], [0], [0], [1], [0, 0, 1, 1], [], []>} : vector<16x128xbf16>, vector<128x128xbf16>, vector<16x128xf32> -> vector<16x128xf32>
    %c0_8 = arith.constant 0 : index
    %c0_9 = arith.constant 0 : index
    %13 = vector.load %arg5[%c0_8, %c0_9] : memref<1x128xf32, #tpu.memory_space<vmem>>, vector<1x128xf32>
    %14 = vector.broadcast %13 : vector<1x128xf32> to vector<16x128xf32>
    %15 = arith.addf %12, %14 : vector<16x128xf32>
    %cst_10 = arith.constant 5.000000e-01 : f32
    %16 = vector.broadcast %cst_10 : f32 to vector<16x128xf32>
    %17 = arith.mulf %16, %15 : vector<16x128xf32>
    %18 = math.tanh %17 : vector<16x128xf32>
    %cst_11 = arith.constant 5.000000e-01 : f32
    %19 = vector.broadcast %cst_11 : f32 to vector<16x128xf32>
    %20 = arith.mulf %19, %18 : vector<16x128xf32>
    %cst_12 = arith.constant 5.000000e-01 : f32
    %21 = vector.broadcast %cst_12 : f32 to vector<16x128xf32>
    %22 = arith.addf %20, %21 : vector<16x128xf32>
    %c0_13 = arith.constant 0 : index
    %c0_14 = arith.constant 0 : index
    %23 = vector.load %arg6[%c0_13, %c0_14] : memref<16x128xf32, #tpu.memory_space<vmem>>, vector<16x128xf32>
    tpu.vector_store %arg6[%c0_13, %c0_14], %22 {strides = array<i32>} : memref<16x128xf32, #tpu.memory_space<vmem>>, vector<16x128xf32>,
    return
  }
  func.func @transform_0(%arg0: i32) -> (i32, i32) {
    %c0_i32 = arith.constant 0 : i32
    %c0_i32_0 = arith.constant 0 : i32
    return %arg0, %c0_i32 : i32, i32
  }
  func.func @transform_1(%arg0: i32) -> (i32, i32) {
    %c0_i32 = arith.constant 0 : i32
    %c0_i32_0 = arith.constant 0 : i32
    %c0_i32_1 = arith.constant 0 : i32
    return %c0_i32, %c0_i32_0 : i32, i32
  }
  func.func @transform_2(%arg0: i32) -> (i32, i32) {
    %c0_i32 = arith.constant 0 : i32
    %c0_i32_0 = arith.constant 0 : i32
    %c0_i32_1 = arith.constant 0 : i32
    return %c0_i32, %c0_i32_0 : i32, i32
  }
  func.func @transform_3(%arg0: i32) -> (i32, i32) {
    %c0_i32 = arith.constant 0 : i32
    %c0_i32_0 = arith.constant 0 : i32
    %c0_i32_1 = arith.constant 0 : i32
    return %c0_i32, %c0_i32_0 : i32, i32
  }
  func.func @transform_4(%arg0: i32) -> (i32, i32) {
    %c0_i32 = arith.constant 0 : i32
    %c0_i32_0 = arith.constant 0 : i32
    %c0_i32_1 = arith.constant 0 : i32
    return %c0_i32, %c0_i32_0 : i32, i32
  }
  func.func @transform_5(%arg0: i32) -> (i32, i32) {
    %c0_i32 = arith.constant 0 : i32
    %c0_i32_0 = arith.constant 0 : i32
    return %arg0, %c0_i32 : i32, i32
  }
}

module attributes {stable_mosaic.version = 11 : i64} {
  func.func @_layer1_kernel(%arg0: i32, %arg1: memref<16x128xbf16, #tpu.memory_space<vmem>>, %arg2: memref<128x128xbf16, #tpu.memory_space<vmem>>, %arg3: memref<16x128xbf16, #tpu.memory_space<vmem>>, %arg4: memref<1x1x128xf32, #tpu.memory_space<vmem>>, %arg5: memref<1x1x128xf32, #tpu.memory_space<vmem>>) attributes {dimension_semantics = [#tpu.dimension_semantics<parallel>], iteration_bounds = array<i64: 1>, scalar_prefetch = 0 : i64, scratch_operands = 0 : i64, tpu.core_type = #tpu.core_type<tc>, window_params = [{transform_indices = @transform_0, window_bounds = array<i64: 16, 128>}, {pipeline_mode = #tpu.pipeline_mode<synchronous>, transform_indices = @transform_1, window_bounds = array<i64: 128, 128>}, {transform_indices = @transform_2, window_bounds = array<i64: 16, 128>}, {transform_indices = @transform_3, window_bounds = array<i64: 1, 1, 128>}, {transform_indices = @transform_4, window_bounds = array<i64: 1, 1, 128>}]} {
    %c0 = arith.constant 0 : index
    %c0_0 = arith.constant 0 : index
    %0 = vector.load %arg1[%c0, %c0_0] : memref<16x128xbf16, #tpu.memory_space<vmem>>, vector<16x128xbf16>
    %c0_1 = arith.constant 0 : index
    %c0_2 = arith.constant 0 : index
    %1 = vector.load %arg2[%c0_1, %c0_2] : memref<128x128xbf16, #tpu.memory_space<vmem>>, vector<128x128xbf16>
    %cst = arith.constant dense<0.000000e+00> : vector<16x128xf32>
    %2 = tpu.matmul %0, %1, %cst {dimension_numbers = #tpu.dot_dimension_numbers<[1], [0], [0], [1], [0, 0, 1, 1], [], []>} : vector<16x128xbf16>, vector<128x128xbf16>, vector<16x128xf32> -> vector<16x128xf32>
    %3 = arith.truncf %2 : vector<16x128xf32> to vector<16x128xbf16>
    %c0_3 = arith.constant 0 : index
    %c0_4 = arith.constant 0 : index
    %4 = vector.load %arg3[%c0_3, %c0_4] : memref<16x128xbf16, #tpu.memory_space<vmem>>, vector<16x128xbf16>
    tpu.vector_store %arg3[%c0_3, %c0_4], %3 {strides = array<i32>} : memref<16x128xbf16, #tpu.memory_space<vmem>>, vector<16x128xbf16>,
    %cst_5 = arith.constant dense<0.000000e+00> : vector<128xf32>
    %5 = vector.multi_reduction <add>, %2, %cst_5 [0] : vector<16x128xf32> to vector<128xf32>
    %6 = vector.shape_cast %5 : vector<128xf32> to vector<1x128xf32>
    %7 = vector.shape_cast %6 : vector<1x128xf32> to vector<1x1x128xf32>
    %c0_6 = arith.constant 0 : index
    %c0_7 = arith.constant 0 : index
    %c0_8 = arith.constant 0 : index
    %8 = vector.load %arg4[%c0_6, %c0_7, %c0_8] : memref<1x1x128xf32, #tpu.memory_space<vmem>>, vector<1x1x128xf32>
    tpu.vector_store %arg4[%c0_6, %c0_7, %c0_8], %7 {strides = array<i32>} : memref<1x1x128xf32, #tpu.memory_space<vmem>>, vector<1x1x128xf32>,
    %9 = arith.mulf %2, %2 : vector<16x128xf32>
    %cst_9 = arith.constant dense<0.000000e+00> : vector<128xf32>
    %10 = vector.multi_reduction <add>, %9, %cst_9 [0] : vector<16x128xf32> to vector<128xf32>
    %11 = vector.shape_cast %10 : vector<128xf32> to vector<1x128xf32>
    %12 = vector.shape_cast %11 : vector<1x128xf32> to vector<1x1x128xf32>
    %c0_10 = arith.constant 0 : index
    %c0_11 = arith.constant 0 : index
    %c0_12 = arith.constant 0 : index
    %13 = vector.load %arg5[%c0_10, %c0_11, %c0_12] : memref<1x1x128xf32, #tpu.memory_space<vmem>>, vector<1x1x128xf32>
    tpu.vector_store %arg5[%c0_10, %c0_11, %c0_12], %12 {strides = array<i32>} : memref<1x1x128xf32, #tpu.memory_space<vmem>>, vector<1x1x128xf32>,
    return
  }
  func.func @transform_0(%arg0: i32) -> (i32, i32) {
    %c0_i32 = arith.constant 0 : i32
    %c0_i32_0 = arith.constant 0 : i32
    return %arg0, %c0_i32 : i32, i32
  }
  func.func @transform_1(%arg0: i32) -> (i32, i32) {
    %c0_i32 = arith.constant 0 : i32
    %c0_i32_0 = arith.constant 0 : i32
    %c0_i32_1 = arith.constant 0 : i32
    return %c0_i32, %c0_i32_0 : i32, i32
  }
  func.func @transform_2(%arg0: i32) -> (i32, i32) {
    %c0_i32 = arith.constant 0 : i32
    %c0_i32_0 = arith.constant 0 : i32
    return %arg0, %c0_i32 : i32, i32
  }
  func.func @transform_3(%arg0: i32) -> (i32, i32, i32) {
    %c0_i32 = arith.constant 0 : i32
    %c0_i32_0 = arith.constant 0 : i32
    %c0_i32_1 = arith.constant 0 : i32
    return %arg0, %c0_i32, %c0_i32_0 : i32, i32, i32
  }
  func.func @transform_4(%arg0: i32) -> (i32, i32, i32) {
    %c0_i32 = arith.constant 0 : i32
    %c0_i32_0 = arith.constant 0 : i32
    %c0_i32_1 = arith.constant 0 : i32
    return %arg0, %c0_i32, %c0_i32_0 : i32, i32, i32
  }
}

module attributes {stable_mosaic.version = 11 : i64} {
  func.func @_layer2_kernel(%arg0: i32, %arg1: memref<16x128xbf16, #tpu.memory_space<vmem>>, %arg2: memref<128x128xbf16, #tpu.memory_space<vmem>>, %arg3: memref<1x128xf32, #tpu.memory_space<vmem>>, %arg4: memref<1x128xf32, #tpu.memory_space<vmem>>, %arg5: memref<16x128xbf16, #tpu.memory_space<vmem>>, %arg6: memref<1x1x128xf32, #tpu.memory_space<vmem>>, %arg7: memref<1x1x128xf32, #tpu.memory_space<vmem>>) attributes {dimension_semantics = [#tpu.dimension_semantics<parallel>], iteration_bounds = array<i64: 1>, scalar_prefetch = 0 : i64, scratch_operands = 0 : i64, tpu.core_type = #tpu.core_type<tc>, window_params = [{transform_indices = @transform_0, window_bounds = array<i64: 16, 128>}, {pipeline_mode = #tpu.pipeline_mode<synchronous>, transform_indices = @transform_1, window_bounds = array<i64: 128, 128>}, {pipeline_mode = #tpu.pipeline_mode<synchronous>, transform_indices = @transform_2, window_bounds = array<i64: 1, 128>}, {pipeline_mode = #tpu.pipeline_mode<synchronous>, transform_indices = @transform_3, window_bounds = array<i64: 1, 128>}, {transform_indices = @transform_4, window_bounds = array<i64: 16, 128>}, {transform_indices = @transform_5, window_bounds = array<i64: 1, 1, 128>}, {transform_indices = @transform_6, window_bounds = array<i64: 1, 1, 128>}]} {
    %c0 = arith.constant 0 : index
    %c0_0 = arith.constant 0 : index
    %0 = vector.load %arg1[%c0, %c0_0] : memref<16x128xbf16, #tpu.memory_space<vmem>>, vector<16x128xbf16>
    %1 = arith.extf %0 : vector<16x128xbf16> to vector<16x128xf32>
    %c0_1 = arith.constant 0 : index
    %c0_2 = arith.constant 0 : index
    %2 = vector.load %arg3[%c0_1, %c0_2] : memref<1x128xf32, #tpu.memory_space<vmem>>, vector<1x128xf32>
    %3 = vector.broadcast %2 : vector<1x128xf32> to vector<16x128xf32>
    %4 = arith.mulf %1, %3 : vector<16x128xf32>
    %c0_3 = arith.constant 0 : index
    %c0_4 = arith.constant 0 : index
    %5 = vector.load %arg4[%c0_3, %c0_4] : memref<1x128xf32, #tpu.memory_space<vmem>>, vector<1x128xf32>
    %6 = vector.broadcast %5 : vector<1x128xf32> to vector<16x128xf32>
    %7 = arith.addf %4, %6 : vector<16x128xf32>
    %cst = arith.constant 0.000000e+00 : f32
    %8 = vector.broadcast %cst : f32 to vector<16x128xf32>
    %9 = arith.maximumf %7, %8 : vector<16x128xf32>
    %10 = arith.truncf %9 : vector<16x128xf32> to vector<16x128xbf16>
    %c0_5 = arith.constant 0 : index
    %c0_6 = arith.constant 0 : index
    %11 = vector.load %arg2[%c0_5, %c0_6] : memref<128x128xbf16, #tpu.memory_space<vmem>>, vector<128x128xbf16>
    %cst_7 = arith.constant dense<0.000000e+00> : vector<16x128xf32>
    %12 = tpu.matmul %10, %11, %cst_7 {dimension_numbers = #tpu.dot_dimension_numbers<[1], [0], [0], [1], [0, 0, 1, 1], [], []>} : vector<16x128xbf16>, vector<128x128xbf16>, vector<16x128xf32> -> vector<16x128xf32>
    %13 = arith.truncf %12 : vector<16x128xf32> to vector<16x128xbf16>
    %c0_8 = arith.constant 0 : index
    %c0_9 = arith.constant 0 : index
    %14 = vector.load %arg5[%c0_8, %c0_9] : memref<16x128xbf16, #tpu.memory_space<vmem>>, vector<16x128xbf16>
    tpu.vector_store %arg5[%c0_8, %c0_9], %13 {strides = array<i32>} : memref<16x128xbf16, #tpu.memory_space<vmem>>, vector<16x128xbf16>,
    %c0_i32 = arith.constant 0 : i32
    %15 = arith.cmpi eq, %arg0, %c0_i32 : i32
    %16 = arith.extui %15 : i1 to i32
    %c0_i32_10 = arith.constant 0 : i32
    %17 = arith.cmpi ne, %16, %c0_i32_10 : i32
    scf.if %17 {
      %21 = tpu.iota {dimensions = array<i32: 0>} : vector<16x1xi32>
      %c16_i32 = arith.constant 16 : i32
      %22 = arith.muli %arg0, %c16_i32 : i32
      %23 = vector.broadcast %22 : i32 to vector<16x1xi32>
      %24 = arith.addi %21, %23 : vector<16x1xi32>
      %c8_i32 = arith.constant 8 : i32
      %25 = vector.broadcast %c8_i32 : i32 to vector<16x1xi32>
      %26 = arith.cmpi slt, %24, %25 : vector<16x1xi32>
      %cst_13 = arith.constant 0.000000e+00 : f32
      %27 = vector.shape_cast %26 : vector<16x1xi1> to vector<16x1xi1>
      %28 = vector.broadcast %27 : vector<16x1xi1> to vector<16x128xi1>
      %29 = vector.broadcast %cst_13 : f32 to vector<16x128xf32>
      %30 = arith.select %28, %12, %29 : vector<16x128xi1>, vector<16x128xf32>
      %cst_14 = arith.constant dense<0.000000e+00> : vector<128xf32>
      %31 = vector.multi_reduction <add>, %30, %cst_14 [0] : vector<16x128xf32> to vector<128xf32>
      %32 = vector.shape_cast %31 : vector<128xf32> to vector<1x128xf32>
      %33 = vector.shape_cast %32 : vector<1x128xf32> to vector<1x1x128xf32>
      %c0_15 = arith.constant 0 : index
      %c0_16 = arith.constant 0 : index
      %c0_17 = arith.constant 0 : index
      %34 = vector.load %arg6[%c0_15, %c0_16, %c0_17] : memref<1x1x128xf32, #tpu.memory_space<vmem>>, vector<1x1x128xf32>
      tpu.vector_store %arg6[%c0_15, %c0_16, %c0_17], %33 {strides = array<i32>} : memref<1x1x128xf32, #tpu.memory_space<vmem>>, vector<1x1x128xf32>,
      %35 = arith.mulf %30, %30 : vector<16x128xf32>
      %cst_18 = arith.constant dense<0.000000e+00> : vector<128xf32>
      %36 = vector.multi_reduction <add>, %35, %cst_18 [0] : vector<16x128xf32> to vector<128xf32>
      %37 = vector.shape_cast %36 : vector<128xf32> to vector<1x128xf32>
      %38 = vector.shape_cast %37 : vector<1x128xf32> to vector<1x1x128xf32>
      %c0_19 = arith.constant 0 : index
      %c0_20 = arith.constant 0 : index
      %c0_21 = arith.constant 0 : index
      %39 = vector.load %arg7[%c0_19, %c0_20, %c0_21] : memref<1x1x128xf32, #tpu.memory_space<vmem>>, vector<1x1x128xf32>
      tpu.vector_store %arg7[%c0_19, %c0_20, %c0_21], %38 {strides = array<i32>} : memref<1x1x128xf32, #tpu.memory_space<vmem>>, vector<1x1x128xf32>,
    } else {
    }
    %c0_i32_11 = arith.constant 0 : i32
    %18 = arith.cmpi slt, %arg0, %c0_i32_11 : i32
    %19 = arith.extui %18 : i1 to i32
    %c0_i32_12 = arith.constant 0 : i32
    %20 = arith.cmpi ne, %19, %c0_i32_12 : i32
    scf.if %20 {
      %cst_13 = arith.constant dense<0.000000e+00> : vector<128xf32>
      %21 = vector.multi_reduction <add>, %12, %cst_13 [0] : vector<16x128xf32> to vector<128xf32>
      %22 = vector.shape_cast %21 : vector<128xf32> to vector<1x128xf32>
      %23 = vector.shape_cast %22 : vector<1x128xf32> to vector<1x1x128xf32>
      %c0_14 = arith.constant 0 : index
      %c0_15 = arith.constant 0 : index
      %c0_16 = arith.constant 0 : index
      %24 = vector.load %arg6[%c0_14, %c0_15, %c0_16] : memref<1x1x128xf32, #tpu.memory_space<vmem>>, vector<1x1x128xf32>
      tpu.vector_store %arg6[%c0_14, %c0_15, %c0_16], %23 {strides = array<i32>} : memref<1x1x128xf32, #tpu.memory_space<vmem>>, vector<1x1x128xf32>,
      %25 = arith.mulf %12, %12 : vector<16x128xf32>
      %cst_17 = arith.constant dense<0.000000e+00> : vector<128xf32>
      %26 = vector.multi_reduction <add>, %25, %cst_17 [0] : vector<16x128xf32> to vector<128xf32>
      %27 = vector.shape_cast %26 : vector<128xf32> to vector<1x128xf32>
      %28 = vector.shape_cast %27 : vector<1x128xf32> to vector<1x1x128xf32>
      %c0_18 = arith.constant 0 : index
      %c0_19 = arith.constant 0 : index
      %c0_20 = arith.constant 0 : index
      %29 = vector.load %arg7[%c0_18, %c0_19, %c0_20] : memref<1x1x128xf32, #tpu.memory_space<vmem>>, vector<1x1x128xf32>
      tpu.vector_store %arg7[%c0_18, %c0_19, %c0_20], %28 {strides = array<i32>} : memref<1x1x128xf32, #tpu.memory_space<vmem>>, vector<1x1x128xf32>,
    } else {
    }
    return
  }
  func.func @transform_0(%arg0: i32) -> (i32, i32) {
    %c0_i32 = arith.constant 0 : i32
    %c0_i32_0 = arith.constant 0 : i32
    return %arg0, %c0_i32 : i32, i32
  }
  func.func @transform_1(%arg0: i32) -> (i32, i32) {
    %c0_i32 = arith.constant 0 : i32
    %c0_i32_0 = arith.constant 0 : i32
    %c0_i32_1 = arith.constant 0 : i32
    return %c0_i32, %c0_i32_0 : i32, i32
  }
  func.func @transform_2(%arg0: i32) -> (i32, i32) {
    %c0_i32 = arith.constant 0 : i32
    %c0_i32_0 = arith.constant 0 : i32
    %c0_i32_1 = arith.constant 0 : i32
    return %c0_i32, %c0_i32_0 : i32, i32
  }
  func.func @transform_3(%arg0: i32) -> (i32, i32) {
    %c0_i32 = arith.constant 0 : i32
    %c0_i32_0 = arith.constant 0 : i32
    %c0_i32_1 = arith.constant 0 : i32
    return %c0_i32, %c0_i32_0 : i32, i32
  }
  func.func @transform_4(%arg0: i32) -> (i32, i32) {
    %c0_i32 = arith.constant 0 : i32
    %c0_i32_0 = arith.constant 0 : i32
    return %arg0, %c0_i32 : i32, i32
  }
  func.func @transform_5(%arg0: i32) -> (i32, i32, i32) {
    %c0_i32 = arith.constant 0 : i32
    %c0_i32_0 = arith.constant 0 : i32
    %c0_i32_1 = arith.constant 0 : i32
    return %arg0, %c0_i32, %c0_i32_0 : i32, i32, i32
  }
  func.func @transform_6(%arg0: i32) -> (i32, i32, i32) {
    %c0_i32 = arith.constant 0 : i32
    %c0_i32_0 = arith.constant 0 : i32
    %c0_i32_1 = arith.constant 0 : i32
    return %arg0, %c0_i32, %c0_i32_0 : i32, i32, i32
  }
}

</mosaic_0001>

<bundles_post_ra>
// kernel: mlp_predictor.5
= control target key start
LH: loop header
LB: loop body
LE: loop exit
PB: predicated region body
PF: predicated region fallthrough
CT: control target
= control target key end

     0   :  { %s258_s1 = inlined_call_operand.vmem [shape: bf16[128,128], index: 1, kind: input, shape index: {}]   ;;  %s259_s2 = inlined_call_operand.vmem [shape: f32[1,128], index: 2, kind: input, shape index: {}]   ;;  %s260_s3 = inlined_call_operand.vmem [shape: f32[1,128], index: 3, kind: input, shape index: {}]   ;;  %s261_s4 = inlined_call_operand.vmem [shape: f32[1,128], index: 4, kind: input, shape index: {}]   ;;  %s262_s0 = inlined_call_operand.vmem [shape: bf16[16,128], index: 0, kind: input, shape index: {}]   ;;  %s263_s5 = inlined_call_operand.vmem [shape: f32[16,128], index: 5, kind: output, shape index: {}]  }
   0x1   :  { %v174_v0 = vld [vmem:[%s258_s1 + $0x38] sm:$0xff]  ;;  %v173_v1 = vld [vmem:[%s258_s1 + $0x30] sm:$0xff]  ;;  %v172_v2 = vld [vmem:[%s258_s1 + $0x28] sm:$0xff] }
   0x2   :  { %107 = vmatpush.bf16.msra.mxu0 %v174_v0  ;;  %v171_v3 = vld [vmem:[%s258_s1 + $0x20] sm:$0xff]  ;;  %v170_v8 = vld [vmem:[%s258_s1 + $0x18] sm:$0xff]  ;;  %v169_v12 = vld [vmem:[%s258_s1 + $0x10] sm:$0xff] }
   0x3   :  { %v176_v4 = vld [vmem:[%s262_s0] sm:$0xff]   ;;  %v168_v15 = vld [vmem:[%s258_s1 + $0x8] sm:$0xff] }
   0x4   :  { %v177_v5 = vunpack.c.l.bf16 %v176_v4  ;;  %v178_v6 = vunpack.c.h.bf16 %v176_v4  ;;  %v179_v7 = vld [vmem:[%s259_s2] ss:$0 sm:$0xff] }
   0x5   :  { %v180_v11 = vld [vmem:[%s260_s3] ss:$0 sm:$0xff] }
   0x6   :  { %108 = vmatpush.bf16.msra.mxu0 %v173_v1  ;;  %v28_v9 = vmul.f32 %v179_v7, %v177_v5  ;;  %v29_v10 = vmul.f32 %v179_v7, %v178_v6  ;;  %v167_v18 = vld [vmem:[%s258_s1] sm:$0xff] }
   0x7   :  { %v181_v20 = vld [vmem:[%s261_s4] ss:$0 sm:$0xff] }
   0x8   :  { %v34_v13 = vadd.f32 %v180_v11, %v28_v9  ;;  %v35_v14 = vadd.f32 %v180_v11, %v29_v10 }
   0xa   :  { %109 = vmatpush.bf16.msra.mxu0 %v172_v2  ;;  %v36_v16 = vmax.f32 %v34_v13, 0.0  ;;  %v37_v17 = vmax.f32 %v35_v14, 0.0 }
   0xc   :  { %v38_v19 = vpack.c.bf16 %v37_v17, %v36_v16 }
   0xe   :  { %110 = vmatpush.bf16.msra.mxu0 %v171_v3 }
  0x12   :  { %111 = vmatpush.bf16.msra.mxu0 %v170_v8 }
  0x16   :  { %112 = vmatpush.bf16.msra.mxu0 %v169_v12 }
  0x1a   :  { %113 = vmatpush.bf16.msra.mxu0 %v168_v15 }
  0x1e   :  { %114 = vmatpush.bf16.msra.mxu0 %v167_v18 }
  0x21   :  { %115 = vmatmul.bf16.vlgmr.msra.gmra.mxu0 %v38_v19 }
  0x9e   :  { %v116_v21 = vpop.f32.mrf.mxu0 }
  0x9f   :  { %v117_v22 = vadd.f32 %v181_v20, %v116_v21 }
  0xa1   :  { %v121_v23 = vmul.f32 0.5, %v117_v22 }
  0xa3   :  { %182 = vtanh.f32 %v121_v23 }
  0xa6   :  { %v118_v24 = vpop.f32.mrf.mxu0 }
  0xa7   :  { %v119_v25 = vadd.f32 %v181_v20, %v118_v24 }
  0xa9   :  { %v183_v26 = vpop.eup %182  ;;  %v122_v27 = vmul.f32 0.5, %v119_v25 }
  0xaa   :  { %v125_v28 = vmul.f32 0.5, %v183_v26 }
  0xab   :  { %184 = vtanh.f32 %v122_v27 }
  0xac   :  { %v127_v29 = vadd.f32 0.5, %v125_v28 }
  0xae   :  { %129 = vst [vmem:[%s263_s5] sm:$0xff] %v127_v29 }
  0xb1   :  { %v185_v30 = vpop.eup %184 }
  0xb2   :  { %v126_v31 = vmul.f32 0.5, %v185_v30 }
  0xb4   :  { %v128_v32 = vadd.f32 0.5, %v126_v31 }
  0xb6   :  { %130 = vst [vmem:[%s263_s5 + $0x8] sm:$0xff] %v128_v32 }

// kernel: mlp_predictor.3
= control target key start
LH: loop header
LB: loop body
LE: loop exit
PB: predicated region body
PF: predicated region fallthrough
CT: control target
= control target key end

     0   :  { %s245_s1 = inlined_call_operand.vmem [shape: bf16[128,128], index: 1, kind: input, shape index: {}]   ;;  %s246_s0 = inlined_call_operand.vmem [shape: bf16[16,128], index: 0, kind: input, shape index: {}]   ;;  %s247_s2 = inlined_call_operand.vmem [shape: bf16[16,128], index: 2, kind: output, shape index: {0}]   ;;  %s248_s3 = inlined_call_operand.vmem [shape: f32[1,1,128], index: 3, kind: output, shape index: {1}]   ;;  %s249_s4 = inlined_call_operand.vmem [shape: f32[1,1,128], index: 4, kind: output, shape index: {2}]  }
   0x1   :  { %v178_v0 = vld [vmem:[%s245_s1 + $0x38] sm:$0xff]  ;;  %v177_v1 = vld [vmem:[%s245_s1 + $0x30] sm:$0xff]  ;;  %v176_v2 = vld [vmem:[%s245_s1 + $0x28] sm:$0xff] }
   0x2   :  { %86 = vmatpush.bf16.msra.mxu0 %v178_v0  ;;  %v175_v3 = vld [vmem:[%s245_s1 + $0x20] sm:$0xff]  ;;  %v174_v4 = vld [vmem:[%s245_s1 + $0x18] sm:$0xff]  ;;  %v173_v5 = vld [vmem:[%s245_s1 + $0x10] sm:$0xff] }
   0x3   :  { %v172_v6 = vld [vmem:[%s245_s1 + $0x8] sm:$0xff]  ;;  %v171_v7 = vld [vmem:[%s245_s1] sm:$0xff] }
   0x4   :  { %v170_v8 = vld [vmem:[%s246_s0] sm:$0xff] }
   0x6   :  { %87 = vmatpush.bf16.msra.mxu0 %v177_v1 }
   0xa   :  { %88 = vmatpush.bf16.msra.mxu0 %v176_v2 }
   0xe   :  { %89 = vmatpush.bf16.msra.mxu0 %v175_v3 }
  0x12   :  { %90 = vmatpush.bf16.msra.mxu0 %v174_v4 }
  0x16   :  { %91 = vmatpush.bf16.msra.mxu0 %v173_v5 }
  0x1a   :  { %92 = vmatpush.bf16.msra.mxu0 %v172_v6 }
  0x1e   :  { %93 = vmatpush.bf16.msra.mxu0 %v171_v7 }
  0x21   :  { %94 = vmatmul.bf16.vlgmr.msra.gmra.mxu0 %v170_v8 }
  0x9e   :  { %v95_v9 = vpop.f32.mrf.mxu0 }
  0x9f   :  { %v112_v11 = vmul.f32 %v95_v9, %v95_v9 }
  0xa6   :  { %v97_v10 = vpop.f32.mrf.mxu0 }
  0xa7   :  { %v182_v12 = vpack.c.bf16 %v97_v10, %v95_v9  ;;  %v104_v13 = vadd.f32 %v97_v10, %v95_v9  ;;  %v113_v14 = vmul.f32 %v97_v10, %v97_v10 }
  0xa9   :  { %183 = vst [vmem:[%s247_s2] sm:$0xff] %v182_v12   ;;  %v105_v15 = vrot.slane %v104_v13, 4  ;;  %v114_v16 = vadd.f32 %v113_v14, %v112_v11 }
  0xab   :  { %v106_v17 = vadd.f32 %v105_v15, %v104_v13  ;;  %v115_v18 = vrot.slane %v114_v16, 4 }
  0xad   :  { %v107_v19 = vrot.slane %v106_v17, 2  ;;  %v116_v20 = vadd.f32 %v115_v18, %v114_v16 }
  0xaf   :  { %v108_v21 = vadd.f32 %v107_v19, %v106_v17  ;;  %v117_v22 = vrot.slane %v116_v20, 2 }
  0xb1   :  { %v109_v23 = vrot.slane %v108_v21, 1  ;;  %v118_v24 = vadd.f32 %v117_v22, %v116_v20 }
  0xb3   :  { %v110_v25 = vadd.f32 %v109_v23, %v108_v21  ;;  %v119_v26 = vrot.slane %v118_v24, 1 }
  0xb5   :  { %111 = vst [vmem:[%s248_s3] sm:$0x1] %v110_v25  ;;  %v120_v27 = vadd.f32 %v119_v26, %v118_v24 }
  0xb7   :  { %121 = vst [vmem:[%s249_s4] sm:$0x1] %v120_v27 }

// kernel: mlp_predictor.4
= control target key start
LH: loop header
LB: loop body
LE: loop exit
PB: predicated region body
PF: predicated region fallthrough
CT: control target
= control target key end

     0   :  { %s320_s1 = inlined_call_operand.vmem [shape: bf16[128,128], index: 1, kind: input, shape index: {}]   ;;  %s321_s2 = inlined_call_operand.vmem [shape: f32[1,128], index: 2, kind: input, shape index: {}]   ;;  %s322_s3 = inlined_call_operand.vmem [shape: f32[1,128], index: 3, kind: input, shape index: {}]   ;;  %s323_s0 = inlined_call_operand.vmem [shape: bf16[16,128], index: 0, kind: input, shape index: {}]   ;;  %s324_s4 = inlined_call_operand.vmem [shape: bf16[16,128], index: 4, kind: output, shape index: {0}]   ;;  %s325_s5 = inlined_call_operand.vmem [shape: f32[1,1,128], index: 5, kind: output, shape index: {1}]   ;;  %s326_s6 = inlined_call_operand.vmem [shape: f32[1,1,128], index: 6, kind: output, shape index: {2}]  }
   0x1   :  { %v231_v0 = vld [vmem:[%s320_s1 + $0x38] sm:$0xff]  ;;  %v230_v1 = vld [vmem:[%s320_s1 + $0x30] sm:$0xff]  ;;  %v229_v2 = vld [vmem:[%s320_s1 + $0x28] sm:$0xff] }
   0x2   :  { %103 = vmatpush.bf16.msra.mxu0 %v231_v0  ;;  %v228_v3 = vld [vmem:[%s320_s1 + $0x20] sm:$0xff]  ;;  %v227_v8 = vld [vmem:[%s320_s1 + $0x18] sm:$0xff]  ;;  %v226_v12 = vld [vmem:[%s320_s1 + $0x10] sm:$0xff] }
   0x3   :  { %v233_v4 = vld [vmem:[%s323_s0] sm:$0xff]   ;;  %v225_v15 = vld [vmem:[%s320_s1 + $0x8] sm:$0xff] }
   0x4   :  { %v234_v5 = vunpack.c.l.bf16 %v233_v4  ;;  %v235_v6 = vunpack.c.h.bf16 %v233_v4  ;;  %v241_v7 = vld [vmem:[%s321_s2] ss:$0 sm:$0xff] }
   0x5   :  { %v242_v11 = vld [vmem:[%s322_s3] ss:$0 sm:$0xff] }
   0x6   :  { %104 = vmatpush.bf16.msra.mxu0 %v230_v1  ;;  %v28_v9 = vmul.f32 %v241_v7, %v234_v5  ;;  %v29_v10 = vmul.f32 %v241_v7, %v235_v6  ;;  %v224_v18 = vld [vmem:[%s320_s1] sm:$0xff] }
   0x8   :  { %v34_v13 = vadd.f32 %v242_v11, %v28_v9  ;;  %v35_v14 = vadd.f32 %v242_v11, %v29_v10 }
   0xa   :  { %105 = vmatpush.bf16.msra.mxu0 %v229_v2  ;;  %v36_v16 = vmax.f32 %v34_v13, 0.0  ;;  %v37_v17 = vmax.f32 %v35_v14, 0.0 }
   0xc   :  { %v38_v19 = vpack.c.bf16 %v37_v17, %v36_v16 }
   0xe   :  { %106 = vmatpush.bf16.msra.mxu0 %v228_v3 }
  0x12   :  { %107 = vmatpush.bf16.msra.mxu0 %v227_v8 }
  0x16   :  { %108 = vmatpush.bf16.msra.mxu0 %v226_v12 }
  0x1a   :  { %109 = vmatpush.bf16.msra.mxu0 %v225_v15 }
  0x1e   :  { %110 = vmatpush.bf16.msra.mxu0 %v224_v18 }
  0x21   :  { %111 = vmatmul.bf16.vlgmr.msra.gmra.mxu0 %v38_v19 }
  0x9e   :  { %v112_v20 = vpop.f32.mrf.mxu0 }
  0x9f   :  { %v141_v21 = vrot.slane %v112_v20, 4  ;;  %v148_v22 = vmul.f32 %v112_v20, %v112_v20 }
  0xa1   :  { %v142_v23 = vadd.f32 %v141_v21, %v112_v20  ;;  %v151_v24 = vrot.slane %v148_v22, 4 }
  0xa3   :  { %v143_v25 = vrot.slane %v142_v23, 2  ;;  %v152_v26 = vadd.f32 %v151_v24, %v148_v22 }
  0xa5   :  { %v144_v27 = vadd.f32 %v143_v25, %v142_v23  ;;  %v153_v28 = vrot.slane %v152_v26, 2 }
  0xa6   :  { %v114_v29 = vpop.f32.mrf.mxu0 }
  0xa7   :  { %v145_v30 = vrot.slane %v144_v27, 1  ;;  %v154_v31 = vadd.f32 %v153_v28, %v152_v26  ;;  %v239_v32 = vpack.c.bf16 %v114_v29, %v112_v20 }
  0xa9   :  { %v146_v33 = vadd.f32 %v145_v30, %v144_v27  ;;  %v155_v34 = vrot.slane %v154_v31, 1  ;;  %240 = vst [vmem:[%s324_s4] sm:$0xff] %v239_v32  }
  0xab   :  { %147 = vst [vmem:[%s325_s5] sm:$0x1] %v146_v33  ;;  %v156_v35 = vadd.f32 %v155_v34, %v154_v31 }
  0xad   :  { %157 = vst [vmem:[%s326_s6] sm:$0x1] %v156_v35 }

</bundles_post_ra>
